<compile_context>
chip_gen: v7x
topology: tpu7x:2x2x1
jax: 0.10.0
libtpu: 0.0.40
codegen_flags: <defaults>
</compile_context>

<pallas_src>
import functools

import jax
import jax.numpy as jnp
from jax.experimental import pallas as pl
from jax.experimental.pallas import tpu as pltpu

LANE = 128  # TPU lane width; every feature axis is padded to this


def _round_up(n, m):
    return ((n + m - 1) // m) * m


# ----------------------------- kernel --------------------------------------

def _leaky_relu(x, slope=0.2):
    return jnp.where(x > 0, x, slope * x)


def _coupling_kernel(cat_ref, aux_ref, w_ref, b_ref, out_ref, *, input_dim, cond_dim):
    D, C = input_dim, cond_dim
    cat = cat_ref[...]            # (TB, 128) f32: [x*mask | cond | x*(1-mask) | 0...]
    mask = aux_ref[0:1, :]        # (1, 128):  [mask | 0 ...]
    inv = aux_ref[1:2, :]         # (1, 128):  [1-mask | 0 ...]   (zero outside [0, D))
    sel = aux_ref[2:3, :]         # (1, 128):  one-hot at lane D  (log_det selector)

    # Fused scale+shift MLP: 4 full-tile MXU matmuls on block-diagonal bf16
    # weights; activations cast to bf16 at the MXU boundary, f32 accumulation,
    # f32 elementwise.  W[0] rows for the x*(1-mask) lanes are zero, so packing
    # those extra lanes into cat does not perturb layer 1.
    a = cat.astype(jnp.bfloat16)
    h = _leaky_relu(jnp.dot(a, w_ref[0], preferred_element_type=jnp.float32) + b_ref[0])
    h = _leaky_relu(jnp.dot(h.astype(jnp.bfloat16), w_ref[1],
                            preferred_element_type=jnp.float32) + b_ref[1])
    h = _leaky_relu(jnp.dot(h.astype(jnp.bfloat16), w_ref[2],
                            preferred_element_type=jnp.float32) + b_ref[2])
    st = jnp.dot(h.astype(jnp.bfloat16), w_ref[3],
                 preferred_element_type=jnp.float32) + b_ref[3]
    # st lanes [0, D) = raw scale-net output, [D, 2D) = raw shift-net output,
    # everything else exactly 0.

    s = jnp.tanh(st) * inv                                    # masked scale, zero outside [0, D)
    t = pltpu.roll(st, shift=LANE - D, axis=1) * inv          # shift aligned to [0, D), masked
    x_inv = pltpu.roll(cat, shift=LANE - (D + C), axis=1) * inv   # x*(1-mask) aligned to [0, D)
    masked_x = cat * mask                                     # x*mask in lanes [0, D), else 0

    z = masked_x + x_inv * jnp.exp(s) + t                     # lanes >= D are exactly 0
    log_det = jnp.sum(s, axis=1, keepdims=True)               # (TB, 1); s already masked

    out_ref[...] = z + log_det * sel                          # pack log_det into lane D


# ----------------------------- parameters -----------------------------------

def _init_linear(key, fan_in, fan_out):
    """torch.nn.Linear-style init; W stored as (fan_in, fan_out), b as (1, fan_out)."""
    k1, k2 = jax.random.split(key)
    bound = 1.0 / jnp.sqrt(float(fan_in))
    W = jax.random.uniform(k1, (fan_in, fan_out), jnp.float32, -bound, bound)
    b = jax.random.uniform(k2, (1, fan_out), jnp.float32, -bound, bound)
    return W, b


def init_params(key, input_dim, hidden_dim, condition_dim):
    keys = jax.random.split(key, 8)
    params = {}
    for name, ks in (("scale", keys[:4]), ("shift", keys[4:])):
        W1, b1 = _init_linear(ks[0], input_dim + condition_dim, hidden_dim)
        W2, b2 = _init_linear(ks[1], hidden_dim, hidden_dim)
        W3, b3 = _init_linear(ks[2], hidden_dim, hidden_dim)
        W4, b4 = _init_linear(ks[3], hidden_dim, input_dim)
        params[name] = dict(W1=W1, b1=b1, W2=W2, b2=b2, W3=W3, b3=b3, W4=W4, b4=b4)
    return params


def pack_params(params, input_dim, hidden_dim, condition_dim):
    """Pack both nets into 2 lane-dense slabs: weights (4,128,128) bf16, biases (4,1,128) f32."""
    D, H, C = input_dim, hidden_dim, condition_dim
    assert 2 * D + C <= LANE and 2 * H <= LANE and 2 * D < LANE, "dims must fit in 128 lanes"
    s, t = params["scale"], params["shift"]

    W = jnp.zeros((4, LANE, LANE), jnp.float32)
    b = jnp.zeros((4, 1, LANE), jnp.float32)

    # Layer 1: cat (D+C) -> [scale hidden | shift hidden] = lanes [0,H) | [H,2H).
    # Rows [D+C, 128) stay zero, so the x*(1-mask) lanes packed into cat are inert.
    W = W.at[0, :D + C, :H].set(s["W1"])
    W = W.at[0, :D + C, H:2 * H].set(t["W1"])
    b = b.at[0, 0, :H].set(s["b1"][0])
    b = b.at[0, 0, H:2 * H].set(t["b1"][0])

    # Layers 2/3: block-diagonal hidden->hidden
    for li, key in ((1, "W2"), (2, "W3")):
        W = W.at[li, :H, :H].set(s[key])
        W = W.at[li, H:2 * H, H:2 * H].set(t[key])
    b = b.at[1, 0, :H].set(s["b2"][0])
    b = b.at[1, 0, H:2 * H].set(t["b2"][0])
    b = b.at[2, 0, :H].set(s["b3"][0])
    b = b.at[2, 0, H:2 * H].set(t["b3"][0])

    # Layer 4: scale hidden -> lanes [0,D); shift hidden -> lanes [D,2D)
    W = W.at[3, :H, :D].set(s["W4"])
    W = W.at[3, H:2 * H, D:2 * D].set(t["W4"])
    b = b.at[3, 0, :D].set(s["b4"][0])
    b = b.at[3, 0, D:2 * D].set(t["b4"][0])

    # Weights feed the MXU -> bf16 (halves bytes, avoids fp32 multi-pass MXU on v5e).
    # Biases are tiny, stay off the MXU, and keep f32 precision.
    return W.astype(jnp.bfloat16), b


# ------------------------------- wrapper -------------------------------------

@functools.partial(jax.jit, static_argnames=("tile_b",))
def conditional_coupling_forward(x, condition, mask, w_packed, b_packed, tile_b=None):
    B, D = x.shape
    C = condition.shape[1]
    assert 2 * D + C <= LANE

    if tile_b is None:
        # Large tiles amortize the ~0.35us per-grid-step overhead (mem-bound
        # kernel), but cap at half the batch (rounded to a sublane multiple of 8)
        # so big batches keep >=2 grid iterations for the two v7x TensorCores.
        tile_b = max(8, min(512, _round_up(pl.cdiv(B, 2), 8)))
    B_pad = _round_up(B, tile_b)

    # Wrapper-side concat + lane/row padding (cheap XLA copies).  Single input
    # activation slab: [x*mask | condition | x*(1-mask)] padded to 128 lanes;
    # padded tail rows are zero, so they stay finite through exp/tanh.
    masked_x = x * mask
    x_inv = x * (1.0 - mask)
    cat = jnp.concatenate([masked_x, condition, x_inv], axis=1)        # (B, 2D+C)
    cat128 = jnp.pad(cat, ((0, B_pad - B), (0, LANE - (2 * D + C))))   # (B_pad, 128)

    # Grid-invariant aux slab: mask row, (1-mask) row, one-hot(log_det lane) row.
    mask128 = jnp.pad(mask, ((0, 0), (0, LANE - D)))
    inv128 = jnp.pad(1.0 - mask, ((0, 0), (0, LANE - D)))
    sel128 = (jnp.arange(LANE) == D).astype(jnp.float32)[None, :]
    aux = jnp.concatenate([mask128, inv128, sel128], axis=0)           # (3, 128)

    grid = (B_pad // tile_b,)
    out = pl.pallas_call(
        functools.partial(_coupling_kernel, input_dim=D, cond_dim=C),
        out_shape=jax.ShapeDtypeStruct((B_pad, LANE), jnp.float32),
        grid=grid,
        in_specs=[
            pl.BlockSpec((tile_b, LANE), lambda i: (i, 0)),            # cat slab
            pl.BlockSpec((3, LANE), lambda i: (0, 0)),                 # aux (grid-invariant)
            pl.BlockSpec((4, LANE, LANE), lambda i: (0, 0, 0)),        # packed bf16 weights
            pl.BlockSpec((4, 1, LANE), lambda i: (0, 0, 0)),           # packed f32 biases
        ],
        out_specs=pl.BlockSpec((tile_b, LANE), lambda i: (i, 0)),
        compiler_params=pltpu.CompilerParams(
            dimension_semantics=("parallel",)),                        # megacore on v7x
    )(cat128, aux, w_packed, b_packed)

    return out[:B, :D], out[:B, D]


# ---------------------------- pure-JAX reference ------------------------------

def reference_forward(x, condition, mask, params, matmul_dtype=jnp.float32):
    """Straight port of the PyTorch forward.  matmul_dtype lets us emulate the
    kernel's bf16 matmul inputs (f32 accumulation) for a tight check."""

    def lin(a, W, b):
        return jnp.dot(a.astype(matmul_dtype), W.astype(matmul_dtype),
                       preferred_element_type=jnp.float32) + b

    def mlp(p, inp):
        h = _leaky_relu(lin(inp, p["W1"], p["b1"]))
        h = _leaky_relu(lin(h, p["W2"], p["b2"]))
        h = _leaky_relu(lin(h, p["W3"], p["b3"]))
        return lin(h, p["W4"], p["b4"])

    masked_x = x * mask
    cat = jnp.concatenate([masked_x, condition], axis=1)
    s = jnp.tanh(mlp(params["scale"], cat)) * (1 - mask)
    t = mlp(params["shift"], cat) * (1 - mask)
    z = masked_x + (1 - mask) * (x * jnp.exp(s) + t)
    log_det = jnp.sum(s * (1 - mask), axis=1)
    return z, log_det


# --------------------------------- main ----------------------------------------

if __name__ == "__main__":
    input_dim, hidden_dim, condition_dim = 4, 32, 4
    batch = 8

    key = jax.random.PRNGKey(0)
    kx, kc, kp = jax.random.split(key, 3)

    x = jax.random.normal(kx, (batch, input_dim), jnp.float32)
    condition = jax.random.normal(kc, (batch, condition_dim), jnp.float32)
    # Alternating RealNVP mask [1, 0, 1, 0, ...] broadcast over the batch.
    mask = (jnp.arange(input_dim) % 2 == 0).astype(jnp.float32)[None, :]

    params = init_params(kp, input_dim, hidden_dim, condition_dim)
    w_packed, b_packed = pack_params(params, input_dim, hidden_dim, condition_dim)

    z, log_det = conditional_coupling_forward(x, condition, mask, w_packed, b_packed)
    jax.block_until_ready((z, log_det))

    # Tight check against a reference that uses the same bf16 matmul inputs
    # (f32 accumulation) as the kernel.
    z_bf, ld_bf = reference_forward(x, condition, mask, params, matmul_dtype=jnp.bfloat16)
    assert jnp.allclose(z, z_bf, atol=2e-4, rtol=2e-4), "z mismatch vs bf16-matmul reference"
    assert jnp.allclose(log_det, ld_bf, atol=2e-4, rtol=2e-4), "log_det mismatch vs bf16-matmul reference"

    # Loose sanity check against the pure f32 reference (bf16 matmul inputs
    # introduce O(1e-2) deviations in the MLP outputs).
    z_f32, ld_f32 = reference_forward(x, condition, mask, params, matmul_dtype=jnp.float32)
    assert jnp.allclose(z, z_f32, atol=1e-1, rtol=1e-1), "z far from f32 reference"
    assert jnp.allclose(log_det, ld_f32, atol=1e-1, rtol=1e-1), "log_det far from f32 reference"

    print("KERNEL_OK")
</pallas_src>

<mosaic_0001>
module attributes {stable_mosaic.version = 11 : i64} {
  func.func @_coupling_kernel(%arg0: i32, %arg1: memref<8x128xf32, #tpu.memory_space<vmem>>, %arg2: memref<3x128xf32, #tpu.memory_space<vmem>>, %arg3: memref<4x128x128xbf16, #tpu.memory_space<vmem>>, %arg4: memref<4x1x128xf32, #tpu.memory_space<vmem>>, %arg5: memref<8x128xf32, #tpu.memory_space<vmem>>) attributes {dimension_semantics = [#tpu.dimension_semantics<parallel>], iteration_bounds = array<i64: 1>, scalar_prefetch = 0 : i64, scratch_operands = 0 : i64, tpu.core_type = #tpu.core_type<tc>, window_params = [{transform_indices = @transform_0, window_bounds = array<i64: 8, 128>}, {pipeline_mode = #tpu.pipeline_mode<synchronous>, transform_indices = @transform_1, window_bounds = array<i64: 3, 128>}, {pipeline_mode = #tpu.pipeline_mode<synchronous>, transform_indices = @transform_2, window_bounds = array<i64: 4, 128, 128>}, {pipeline_mode = #tpu.pipeline_mode<synchronous>, transform_indices = @transform_3, window_bounds = array<i64: 4, 1, 128>}, {transform_indices = @transform_4, window_bounds = array<i64: 8, 128>}]} {
    %c0 = arith.constant 0 : index
    %c0_0 = arith.constant 0 : index
    %0 = vector.load %arg1[%c0, %c0_0] : memref<8x128xf32, #tpu.memory_space<vmem>>, vector<8x128xf32>
    %c0_1 = arith.constant 0 : index
    %c0_2 = arith.constant 0 : index
    %1 = vector.load %arg2[%c0_1, %c0_2] : memref<3x128xf32, #tpu.memory_space<vmem>>, vector<1x128xf32>
    %c1 = arith.constant 1 : index
    %c0_3 = arith.constant 0 : index
    %2 = vector.load %arg2[%c1, %c0_3] : memref<3x128xf32, #tpu.memory_space<vmem>>, vector<1x128xf32>
    %c2 = arith.constant 2 : index
    %c0_4 = arith.constant 0 : index
    %3 = vector.load %arg2[%c2, %c0_4] : memref<3x128xf32, #tpu.memory_space<vmem>>, vector<1x128xf32>
    %4 = arith.truncf %0 : vector<8x128xf32> to vector<8x128xbf16>
    %c0_5 = arith.constant 0 : index
    %c0_6 = arith.constant 0 : index
    %c0_7 = arith.constant 0 : index
    %5 = vector.load %arg3[%c0_5, %c0_6, %c0_7] : memref<4x128x128xbf16, #tpu.memory_space<vmem>>, vector<1x128x128xbf16>
    %6 = vector.shape_cast %5 : vector<1x128x128xbf16> to vector<128x128xbf16>
    %cst = arith.constant dense<0.000000e+00> : vector<8x128xf32>
    %7 = tpu.matmul %4, %6, %cst {dimension_numbers = #tpu.dot_dimension_numbers<[1], [0], [0], [1], [0, 0, 1, 1], [], []>} : vector<8x128xbf16>, vector<128x128xbf16>, vector<8x128xf32> -> vector<8x128xf32>
    %c0_8 = arith.constant 0 : index
    %c0_9 = arith.constant 0 : index
    %c0_10 = arith.constant 0 : index
    %8 = vector.load %arg4[%c0_8, %c0_9, %c0_10] : memref<4x1x128xf32, #tpu.memory_space<vmem>>, vector<1x1x128xf32>
    %9 = vector.shape_cast %8 : vector<1x1x128xf32> to vector<1x128xf32>
    %10 = vector.broadcast %9 : vector<1x128xf32> to vector<8x128xf32>
    %11 = arith.addf %7, %10 : vector<8x128xf32>
    %cst_11 = arith.constant 0.000000e+00 : f32
    %12 = vector.broadcast %cst_11 : f32 to vector<8x128xf32>
    %13 = arith.cmpf ogt, %11, %12 : vector<8x128xf32>
    %cst_12 = arith.constant 2.000000e-01 : f32
    %14 = vector.broadcast %cst_12 : f32 to vector<8x128xf32>
    %15 = arith.mulf %14, %11 : vector<8x128xf32>
    %16 = arith.select %13, %11, %15 : vector<8x128xi1>, vector<8x128xf32>
    %17 = arith.truncf %16 : vector<8x128xf32> to vector<8x128xbf16>
    %c1_13 = arith.constant 1 : index
    %c0_14 = arith.constant 0 : index
    %c0_15 = arith.constant 0 : index
    %18 = vector.load %arg3[%c1_13, %c0_14, %c0_15] : memref<4x128x128xbf16, #tpu.memory_space<vmem>>, vector<1x128x128xbf16>
    %19 = vector.shape_cast %18 : vector<1x128x128xbf16> to vector<128x128xbf16>
    %cst_16 = arith.constant dense<0.000000e+00> : vector<8x128xf32>
    %20 = tpu.matmul %17, %19, %cst_16 {dimension_numbers = #tpu.dot_dimension_numbers<[1], [0], [0], [1], [0, 0, 1, 1], [], []>} : vector<8x128xbf16>, vector<128x128xbf16>, vector<8x128xf32> -> vector<8x128xf32>
    %c1_17 = arith.constant 1 : index
    %c0_18 = arith.constant 0 : index
    %c0_19 = arith.constant 0 : index
    %21 = vector.load %arg4[%c1_17, %c0_18, %c0_19] : memref<4x1x128xf32, #tpu.memory_space<vmem>>, vector<1x1x128xf32>
    %22 = vector.shape_cast %21 : vector<1x1x128xf32> to vector<1x128xf32>
    %23 = vector.broadcast %22 : vector<1x128xf32> to vector<8x128xf32>
    %24 = arith.addf %20, %23 : vector<8x128xf32>
    %cst_20 = arith.constant 0.000000e+00 : f32
    %25 = vector.broadcast %cst_20 : f32 to vector<8x128xf32>
    %26 = arith.cmpf ogt, %24, %25 : vector<8x128xf32>
    %cst_21 = arith.constant 2.000000e-01 : f32
    %27 = vector.broadcast %cst_21 : f32 to vector<8x128xf32>
    %28 = arith.mulf %27, %24 : vector<8x128xf32>
    %29 = arith.select %26, %24, %28 : vector<8x128xi1>, vector<8x128xf32>
    %30 = arith.truncf %29 : vector<8x128xf32> to vector<8x128xbf16>
    %c2_22 = arith.constant 2 : index
    %c0_23 = arith.constant 0 : index
    %c0_24 = arith.constant 0 : index
    %31 = vector.load %arg3[%c2_22, %c0_23, %c0_24] : memref<4x128x128xbf16, #tpu.memory_space<vmem>>, vector<1x128x128xbf16>
    %32 = vector.shape_cast %31 : vector<1x128x128xbf16> to vector<128x128xbf16>
    %cst_25 = arith.constant dense<0.000000e+00> : vector<8x128xf32>
    %33 = tpu.matmul %30, %32, %cst_25 {dimension_numbers = #tpu.dot_dimension_numbers<[1], [0], [0], [1], [0, 0, 1, 1], [], []>} : vector<8x128xbf16>, vector<128x128xbf16>, vector<8x128xf32> -> vector<8x128xf32>
    %c2_26 = arith.constant 2 : index
    %c0_27 = arith.constant 0 : index
    %c0_28 = arith.constant 0 : index
    %34 = vector.load %arg4[%c2_26, %c0_27, %c0_28] : memref<4x1x128xf32, #tpu.memory_space<vmem>>, vector<1x1x128xf32>
    %35 = vector.shape_cast %34 : vector<1x1x128xf32> to vector<1x128xf32>
    %36 = vector.broadcast %35 : vector<1x128xf32> to vector<8x128xf32>
    %37 = arith.addf %33, %36 : vector<8x128xf32>
    %cst_29 = arith.constant 0.000000e+00 : f32
    %38 = vector.broadcast %cst_29 : f32 to vector<8x128xf32>
    %39 = arith.cmpf ogt, %37, %38 : vector<8x128xf32>
    %cst_30 = arith.constant 2.000000e-01 : f32
    %40 = vector.broadcast %cst_30 : f32 to vector<8x128xf32>
    %41 = arith.mulf %40, %37 : vector<8x128xf32>
    %42 = arith.select %39, %37, %41 : vector<8x128xi1>, vector<8x128xf32>
    %43 = arith.truncf %42 : vector<8x128xf32> to vector<8x128xbf16>
    %c3 = arith.constant 3 : index
    %c0_31 = arith.constant 0 : index
    %c0_32 = arith.constant 0 : index
    %44 = vector.load %arg3[%c3, %c0_31, %c0_32] : memref<4x128x128xbf16, #tpu.memory_space<vmem>>, vector<1x128x128xbf16>
    %45 = vector.shape_cast %44 : vector<1x128x128xbf16> to vector<128x128xbf16>
    %cst_33 = arith.constant dense<0.000000e+00> : vector<8x128xf32>
    %46 = tpu.matmul %43, %45, %cst_33 {dimension_numbers = #tpu.dot_dimension_numbers<[1], [0], [0], [1], [0, 0, 1, 1], [], []>} : vector<8x128xbf16>, vector<128x128xbf16>, vector<8x128xf32> -> vector<8x128xf32>
    %c3_34 = arith.constant 3 : index
    %c0_35 = arith.constant 0 : index
    %c0_36 = arith.constant 0 : index
    %47 = vector.load %arg4[%c3_34, %c0_35, %c0_36] : memref<4x1x128xf32, #tpu.memory_space<vmem>>, vector<1x1x128xf32>
    %48 = vector.shape_cast %47 : vector<1x1x128xf32> to vector<1x128xf32>
    %49 = vector.broadcast %48 : vector<1x128xf32> to vector<8x128xf32>
    %50 = arith.addf %46, %49 : vector<8x128xf32>
    %51 = math.tanh %50 : vector<8x128xf32>
    %52 = vector.broadcast %2 : vector<1x128xf32> to vector<8x128xf32>
    %53 = arith.mulf %51, %52 : vector<8x128xf32>
    %c124_i32 = arith.constant 124 : i32
    %54 = tpu.dynamic_rotate %50 by %c124_i32 dim 1 : vector<8x128xf32>, i32 -> vector<8x128xf32>
    %55 = vector.broadcast %2 : vector<1x128xf32> to vector<8x128xf32>
    %56 = arith.mulf %54, %55 : vector<8x128xf32>
    %c120_i32 = arith.constant 120 : i32
    %57 = tpu.dynamic_rotate %0 by %c120_i32 dim 1 : vector<8x128xf32>, i32 -> vector<8x128xf32>
    %58 = vector.broadcast %2 : vector<1x128xf32> to vector<8x128xf32>
    %59 = arith.mulf %57, %58 : vector<8x128xf32>
    %60 = vector.broadcast %1 : vector<1x128xf32> to vector<8x128xf32>
    %61 = arith.mulf %0, %60 : vector<8x128xf32>
    %62 = math.exp %53 : vector<8x128xf32>
    %63 = arith.mulf %59, %62 : vector<8x128xf32>
    %64 = arith.addf %61, %63 : vector<8x128xf32>
    %65 = arith.addf %64, %56 : vector<8x128xf32>
    %cst_37 = arith.constant dense<0.000000e+00> : vector<8xf32>
    %66 = vector.multi_reduction <add>, %53, %cst_37 [1] : vector<8x128xf32> to vector<8xf32>
    %67 = vector.shape_cast %66 : vector<8xf32> to vector<8x1xf32>
    %68 = vector.broadcast %67 : vector<8x1xf32> to vector<8x128xf32>
    %69 = vector.broadcast %3 : vector<1x128xf32> to vector<8x128xf32>
    %70 = arith.mulf %68, %69 : vector<8x128xf32>
    %71 = arith.addf %65, %70 : vector<8x128xf32>
    %c0_38 = arith.constant 0 : index
    %c0_39 = arith.constant 0 : index
    %72 = vector.load %arg5[%c0_38, %c0_39] : memref<8x128xf32, #tpu.memory_space<vmem>>, vector<8x128xf32>
    tpu.vector_store %arg5[%c0_38, %c0_39], %71 {strides = array<i32>} : memref<8x128xf32, #tpu.memory_space<vmem>>, vector<8x128xf32>,
    return
  }
  func.func @transform_0(%arg0: i32) -> (i32, i32) {
    %c0_i32 = arith.constant 0 : i32
    %c0_i32_0 = arith.constant 0 : i32
    return %arg0, %c0_i32 : i32, i32
  }
  func.func @transform_1(%arg0: i32) -> (i32, i32) {
    %c0_i32 = arith.constant 0 : i32
    %c0_i32_0 = arith.constant 0 : i32
    %c0_i32_1 = arith.constant 0 : i32
    return %c0_i32, %c0_i32_0 : i32, i32
  }
  func.func @transform_2(%arg0: i32) -> (i32, i32, i32) {
    %c0_i32 = arith.constant 0 : i32
    %c0_i32_0 = arith.constant 0 : i32
    %c0_i32_1 = arith.constant 0 : i32
    %c0_i32_2 = arith.constant 0 : i32
    return %c0_i32, %c0_i32_0, %c0_i32_1 : i32, i32, i32
  }
  func.func @transform_3(%arg0: i32) -> (i32, i32, i32) {
    %c0_i32 = arith.constant 0 : i32
    %c0_i32_0 = arith.constant 0 : i32
    %c0_i32_1 = arith.constant 0 : i32
    %c0_i32_2 = arith.constant 0 : i32
    return %c0_i32, %c0_i32_0, %c0_i32_1 : i32, i32, i32
  }
  func.func @transform_4(%arg0: i32) -> (i32, i32) {
    %c0_i32 = arith.constant 0 : i32
    %c0_i32_0 = arith.constant 0 : i32
    return %arg0, %c0_i32 : i32, i32
  }
}

</mosaic_0001>

<bundles_post_ra>
// kernel: conditional_coupling_forward.1
= control target key start
LH: loop header
LB: loop body
LE: loop exit
PB: predicated region body
PF: predicated region fallthrough
CT: control target
= control target key end

     0   :  { %9 = vsyncpa [#allocation3], 0  ;;  %s760_s15 = smov [#allocation2]   ;;  %s877_s0 = inlined_call_operand.vmem [shape: f32[8,128], index: 0, kind: input, shape index: {}]   ;;  %s878_s1 = inlined_call_operand.vmem [shape: f32[3,128], index: 1, kind: input, shape index: {}]   ;;  %s879_s2 = inlined_call_operand.hbm [shape: bf16[4,128,128], index: 2, kind: input, shape index: {}]   ;;  %s880_s3 = inlined_call_operand.vmem [shape: f32[4,1,128], index: 3, kind: input, shape index: {}]   ;;  %s881_s4 = inlined_call_operand.vmem [shape: f32[8,128], index: 4, kind: output, shape index: {}]  }
   0x1   :  { %s19_s16 = sshll.u32 %s760_s15, 4  ;;  %s736_s19 = scalar_lea.hbm %s879_s2, 4096  ;;  %s20_s16 = int_to_ptr.vmem [resolvable:$true] %s19_s16 }
   0x2   :  { %p737_p0 = scmp.ne.s32.totalorder %s879_s2, %s736_s19  ;;  %p740_p1 = scmp.lt.u32.totalorder %s736_s19, %s879_s2 }
   0x4   :  { %p742_p2 = pnand %p740_p1, %p737_p0 }
   0x6   :  { %745 = shalt.err (!%p742_p2)
}
   0x7   :  { %s746_s24 = scalar_lea.vmem %s20_s16, 4096  ;;  %p751_p4 = scmp.lt.s32.totalorder %s20_s16, %s20_s16 }
   0x8   :  { %p747_p3 = scmp.ne.s32.totalorder %s20_s16, %s746_s24  ;;  %p752_p5 = scmp.lt.s32.totalorder %s746_s24, %s746_s24 }
   0xa   :  { %p753_p6 = por %p752_p5, %p751_p4 }
   0xc   :  { %p754_p7 = pnand %p753_p6, %p747_p3 }
   0xe   :  { %757 = shalt.err (!%p754_p7)
}
   0xf   :  { %s761_s25 = smov 64   ;;  %s762_s26 = smov 4  }
  0x10   :  { %25 = dma.hbm_to_vmem [thread:$0]  %s879_s2, 4096, %s20_s16, [#allocation3], %s761_s25, %s761_s25, %s762_s26  }
  0x11   :  { %758 = dma.done.wait [#allocation3], 4096  }
  0x12   :  { %759 = vsyncadd [#allocation3], 4294963200  ;;  %v763_v0 = vmov 0.0   ;;  %vm764_vm0 = vmmov 0   ;;  %v700_v1 = vld [vmem:[#allocation2] sm:$0xff]   ;;  %v701_v2 = vld [vmem:[#allocation2 + $0x8] sm:$0xff]  }
  0x13   :  { %613 = vmatprep.subr.bf16.mxu0 %v763_v0  ;;  %629 = vmatprep.mubr.msk.bf16.mxu0 %vm764_vm0, %v763_v0  ;;  %v702_v3 = vld [vmem:[#allocation2 + $0x10] sm:$0xff]   ;;  %v708_v4 = vld [vmem:[#allocation2 + $0x40] sm:$0xff]   ;;  %v703_v5 = vld [vmem:[#allocation2 + $0x18] sm:$0xff]   ;;  %s765_s11 = smov 124   ;;  %s766_s14 = smov 120  }
  0x14   :  { %633 = vmatprep.subr.bf16.mxu1 %v763_v0  ;;  %649 = vmatprep.mubr.msk.bf16.mxu1 %vm764_vm0, %v763_v0  ;;  %v709_v6 = vld [vmem:[#allocation2 + $0x48] sm:$0xff]   ;;  %v704_v7 = vld [vmem:[#allocation2 + $0x20] sm:$0xff]   ;;  %v710_v8 = vld [vmem:[#allocation2 + $0x50] sm:$0xff]  }
  0x15   :  { %614 = vmatpush3.bf16.msra.mxu0 %v700_v1  ;;  %634 = vmatpush3.bf16.msra.mxu1 %v708_v4  ;;  %v705_v9 = vld [vmem:[#allocation2 + $0x28] sm:$0xff]   ;;  %v711_v10 = vld [vmem:[#allocation2 + $0x58] sm:$0xff]   ;;  %v706_v11 = vld [vmem:[#allocation2 + $0x30] sm:$0xff]  }
  0x16   :  { %615 = vmatprep.subr.bf16.mxu0 %v763_v0  ;;  %635 = vmatprep.subr.bf16.mxu1 %v763_v0  ;;  %v712_v12 = vld [vmem:[#allocation2 + $0x60] sm:$0xff]   ;;  %v707_v13 = vld [vmem:[#allocation2 + $0x38] sm:$0xff]   ;;  %v713_v15 = vld [vmem:[#allocation2 + $0x68] sm:$0xff]  }
  0x17   :  { %v823_v14 = vld [vmem:[%s877_s0] sm:$0xff]  ;;  %v714_v17 = vld [vmem:[#allocation2 + $0x70] sm:$0xff]   ;;  %v715_v18 = vld [vmem:[#allocation2 + $0x78] sm:$0xff]  }
  0x18   :  { %v36_v16 = vpack.c.bf16 %v823_v14, %v823_v14  ;;  %v716_v19 = vld [vmem:[#allocation2 + $0x80] sm:$0xff]   ;;  %v717_v20 = vld [vmem:[#allocation2 + $0x88] sm:$0xff]   ;;  %v718_v21 = vld [vmem:[#allocation2 + $0x90] sm:$0xff]  }
  0x19   :  { %616 = vmatpush3.bf16.msra.mxu0 %v701_v2  ;;  %636 = vmatpush3.bf16.msra.mxu1 %v709_v6  ;;  %v719_v22 = vld [vmem:[#allocation2 + $0x98] sm:$0xff]   ;;  %v720_v23 = vld [vmem:[#allocation2 + $0xa0] sm:$0xff]   ;;  %v721_v24 = vld [vmem:[#allocation2 + $0xa8] sm:$0xff]  }
  0x1a   :  { %617 = vmatprep.subr.bf16.mxu0 %v763_v0  ;;  %637 = vmatprep.subr.bf16.mxu1 %v763_v0  ;;  %v535_v25 = vld [vmem:[%s880_s3] ss:$0 sm:$0xff]  ;;  %v722_v34 = vld [vmem:[#allocation2 + $0xb0] sm:$0xff]   ;;  %v723_v35 = vld [vmem:[#allocation2 + $0xb8] sm:$0xff]  }
  0x1b   :  { %v724_v36 = vld [vmem:[#allocation2 + $0xc0] sm:$0xff]   ;;  %v725_v37 = vld [vmem:[#allocation2 + $0xc8] sm:$0xff]   ;;  %v726_v38 = vld [vmem:[#allocation2 + $0xd0] sm:$0xff]  }
  0x1c   :  { %v727_v39 = vld [vmem:[#allocation2 + $0xd8] sm:$0xff]   ;;  %v728_v40 = vld [vmem:[#allocation2 + $0xe0] sm:$0xff]   ;;  %v729_v41 = vld [vmem:[#allocation2 + $0xe8] sm:$0xff]  }
  0x1d   :  { %618 = vmatpush3.bf16.msra.mxu0 %v702_v3  ;;  %638 = vmatpush3.bf16.msra.mxu1 %v710_v8  ;;  %v545_v42 = vld [vmem:[%s880_s3 + $0x1] ss:$0 sm:$0xff]  ;;  %v730_v51 = vld [vmem:[#allocation2 + $0xf0] sm:$0xff]   ;;  %v731_v52 = vld [vmem:[#allocation2 + $0xf8] sm:$0xff]  }
  0x1e   :  { %619 = vmatprep.subr.bf16.mxu0 %v763_v0  ;;  %639 = vmatprep.subr.bf16.mxu1 %v763_v0  ;;  %v555_v53 = vld [vmem:[%s880_s3 + $0x2] ss:$0 sm:$0xff]  ;;  %v565_v62 = vld [vmem:[%s880_s3 + $0x3] ss:$0 sm:$0xff]  ;;  %v574_v4 = vld [vmem:[%s878_s1 + $0x1] ss:$0 sm:$0xff] }
  0x21   :  { %620 = vmatpush3.bf16.msra.mxu0 %v703_v5  ;;  %640 = vmatpush3.bf16.msra.mxu1 %v711_v10 }
  0x22   :  { %621 = vmatprep.subr.bf16.mxu0 %v763_v0  ;;  %641 = vmatprep.subr.bf16.mxu1 %v763_v0 }
  0x25   :  { %622 = vmatpush3.bf16.msra.mxu0 %v704_v7  ;;  %642 = vmatpush3.bf16.msra.mxu1 %v712_v12 }
  0x26   :  { %623 = vmatprep.subr.bf16.mxu0 %v763_v0  ;;  %643 = vmatprep.subr.bf16.mxu1 %v763_v0 }
  0x29   :  { %624 = vmatpush3.bf16.msra.mxu0 %v705_v9  ;;  %644 = vmatpush3.bf16.msra.mxu1 %v713_v15  ;;  %v575_v9 = vld [vmem:[%s878_s1] ss:$0 sm:$0xff] }
  0x2a   :  { %625 = vmatprep.subr.bf16.mxu0 %v763_v0  ;;  %645 = vmatprep.subr.bf16.mxu1 %v763_v0 }
  0x2d   :  { %626 = vmatpush3.bf16.msra.mxu0 %v706_v11  ;;  %646 = vmatpush3.bf16.msra.mxu1 %v714_v17  ;;  %v515_v11 = vmul.f32 %v575_v9, %v823_v14  ;;  %v576_v17 = vld [vmem:[%s878_s1 + $0x2] ss:$0 sm:$0xff] }
  0x2e   :  { %627 = vmatprep.subr.bf16.mxu0 %v763_v0  ;;  %647 = vmatprep.subr.bf16.mxu1 %v763_v0 }
  0x31   :  { %628 = vmatpush3.bf16.msra.mxu0 %v707_v13  ;;  %648 = vmatpush3.bf16.msra.mxu1 %v715_v18 }
  0x32   :  { %653 = vmatprep.subr.bf16.mxu0 %v763_v0  ;;  %673 = vmatprep.subr.bf16.mxu1 %v763_v0 }
  0x34   :  { %630 = vmatmul.mubr.bf16.vlgmr.msra.gmra.mrb[0].mxu0 %v36_v16 }
  0x35   :  { %669 = vmatprep.mubr.msk.bf16.mxu0 %vm764_vm0, %v763_v0  ;;  %654 = vmatpush3.bf16.msra.mxu0 %v716_v19 }
  0x36   :  { %655 = vmatprep.subr.bf16.mxu0 %v763_v0 }
  0x39   :  { %656 = vmatpush3.bf16.msra.mxu0 %v717_v20 }
  0x3a   :  { %657 = vmatprep.subr.bf16.mxu0 %v763_v0 }
  0x3d   :  { %658 = vmatpush3.bf16.msra.mxu0 %v718_v21 }
  0x3e   :  { %659 = vmatprep.subr.bf16.mxu0 %v763_v0 }
  0x41   :  { %660 = vmatpush3.bf16.msra.mxu0 %v719_v22 }
  0x42   :  { %661 = vmatprep.subr.bf16.mxu0 %v763_v0 }
  0x45   :  { %662 = vmatpush3.bf16.msra.mxu0 %v720_v23 }
  0x46   :  { %663 = vmatprep.subr.bf16.mxu0 %v763_v0 }
  0x49   :  { %664 = vmatpush3.bf16.msra.mxu0 %v721_v24 }
  0x4a   :  { %665 = vmatprep.subr.bf16.mxu0 %v763_v0 }
  0x4d   :  { %666 = vmatpush3.bf16.msra.mxu0 %v722_v34 }
  0x4e   :  { %667 = vmatprep.subr.bf16.mxu0 %v763_v0 }
  0x51   :  { %668 = vmatpush3.bf16.msra.mxu0 %v723_v35 }
 0x107   :  { %v142_v26 = vpop.f32.mrb[0].mxu0 }
 0x108   :  { %v143_v27 = vadd.f32 %v535_v25, %v142_v26  ;;  %v631_v28 = vpop.f32.mrb[1].mxu0 }
 0x109   :  { %v145_v29 = vpop.f32.mrb[2].mxu0 }
 0x10a   :  { %vm148_vm1 = vcmp.gt.f32.partialorder %v143_v27, 0.0  ;;  %v149_v30 = vmul.f32 0.2, %v143_v27  ;;  %v632_v31 = vpop.f32.mrb[3].mxu0 }
 0x10c   :  { %v150_v32 = vsel %vm148_vm1, %v143_v27, %v149_v30 }
 0x10d   :  { %v151_v33 = vpack.c.bf16 %v150_v32, %v150_v32 }
 0x10f   :  { %650 = vmatmul.mubr.bf16.vlgmr.msra.gmra.mrb[0].mxu1 %v151_v33 }
 0x110   :  { %689 = vmatprep.mubr.msk.bf16.mxu1 %vm764_vm0, %v763_v0  ;;  %674 = vmatpush3.bf16.msra.mxu1 %v724_v36 }
 0x111   :  { %675 = vmatprep.subr.bf16.mxu1 %v763_v0 }
 0x114   :  { %676 = vmatpush3.bf16.msra.mxu1 %v725_v37 }
 0x115   :  { %677 = vmatprep.subr.bf16.mxu1 %v763_v0 }
 0x118   :  { %678 = vmatpush3.bf16.msra.mxu1 %v726_v38 }
 0x119   :  { %679 = vmatprep.subr.bf16.mxu1 %v763_v0 }
 0x11c   :  { %680 = vmatpush3.bf16.msra.mxu1 %v727_v39 }
 0x11d   :  { %681 = vmatprep.subr.bf16.mxu1 %v763_v0 }
 0x120   :  { %682 = vmatpush3.bf16.msra.mxu1 %v728_v40 }
 0x121   :  { %683 = vmatprep.subr.bf16.mxu1 %v763_v0 }
 0x124   :  { %684 = vmatpush3.bf16.msra.mxu1 %v729_v41 }
 0x125   :  { %685 = vmatprep.subr.bf16.mxu1 %v763_v0 }
 0x128   :  { %686 = vmatpush3.bf16.msra.mxu1 %v730_v51 }
 0x129   :  { %687 = vmatprep.subr.bf16.mxu1 %v763_v0 }
 0x12c   :  { %688 = vmatpush3.bf16.msra.mxu1 %v731_v52 }
 0x1e2   :  { %v259_v43 = vpop.f32.mrb[0].mxu1 }
 0x1e3   :  { %v260_v44 = vadd.f32 %v545_v42, %v259_v43  ;;  %v651_v45 = vpop.f32.mrb[1].mxu1 }
 0x1e4   :  { %v262_v46 = vpop.f32.mrb[2].mxu1 }
 0x1e5   :  { %vm265_vm2 = vcmp.gt.f32.partialorder %v260_v44, 0.0  ;;  %v266_v47 = vmul.f32 0.2, %v260_v44  ;;  %v652_v48 = vpop.f32.mrb[3].mxu1 }
 0x1e7   :  { %v267_v49 = vsel %vm265_vm2, %v260_v44, %v266_v47 }
 0x1e8   :  { %v268_v50 = vpack.c.bf16 %v267_v49, %v267_v49 }
 0x1ea   :  { %670 = vmatmul.mubr.bf16.vlgmr.msra.gmra.mrb[4].mxu0 %v268_v50 }
 0x2bd   :  { %v376_v54 = vpop.f32.mrb[4].mxu0 }
 0x2be   :  { %v377_v55 = vadd.f32 %v555_v53, %v376_v54  ;;  %v671_v56 = vpop.f32.mrb[5].mxu0 }
 0x2bf   :  { %v379_v57 = vpop.f32.mrb[6].mxu0 }
 0x2c0   :  { %vm382_vm3 = vcmp.gt.f32.partialorder %v377_v55, 0.0  ;;  %v383_v58 = vmul.f32 0.2, %v377_v55  ;;  %v672_v59 = vpop.f32.mrb[7].mxu0 }
 0x2c2   :  { %v384_v60 = vsel %vm382_vm3, %v377_v55, %v383_v58 }
 0x2c3   :  { %v385_v61 = vpack.c.bf16 %v384_v60, %v384_v60 }
 0x2c5   :  { %690 = vmatmul.mubr.bf16.vlgmr.msra.gmra.mrb[4].mxu1 %v385_v61 }
 0x398   :  { %v493_v63 = vpop.f32.mrb[4].mxu1 }
 0x399   :  { %v494_v0 = vadd.f32 %v565_v62, %v493_v63  ;;  %v691_v1 = vpop.f32.mrb[5].mxu1 }
 0x39a   :  { %v496_v2 = vpop.f32.mrb[6].mxu1 }
 0x39b   :  { %732 = vtanh.f32 %v494_v0  ;;  %505 = vrot.lane.b32.xlu1 %v494_v0, %s765_s11  ;;  %v692_v3 = vpop.f32.mrb[7].mxu1 }
 0x3a5   :  { %v733_v5 = vpop.eup %732 }
 0x3a6   :  { %v504_v6 = vmul.f32 %v733_v5, %v574_v4 }
 0x3a8   :  { %521 = vadd.xlane.f32.xlu0 %v504_v6  ;;  %v516_v7 = vmul.f32 1.442695, %v504_v6 }
 0x3aa   :  { %734 = vpow2.f32 %v516_v7 }
 0x3b4   :  { %v735_v13 = vpop.eup %734 }
 0x3be   :  { %508 = vrot.lane.b32.xlu0 %v823_v14, %s766_s14 }
 0x40d   :  { %v506_v15 = vpop.permute.xlu1 %505 }
 0x40e   :  { %v507_v18 = vmul.f32 %v574_v4, %v506_v15 }
 0x435   :  { %v522_v8 = vpop.xlane.xlu0 %521 }
 0x436   :  { %v527_v20 = vmul.f32 %v576_v17, %v522_v8 }
 0x439   :  { %v509_v10 = vpop.permute.xlu0 %508 }
 0x43a   :  { %v510_v12 = vmul.f32 %v574_v4, %v509_v10 }
 0x43c   :  { %v518_v16 = vmul.f32 %v735_v13, %v510_v12 }
 0x43e   :  { %v519_v19 = vadd.f32 %v518_v16, %v515_v11 }
 0x440   :  { %v520_v21 = vadd.f32 %v519_v19, %v507_v18 }
 0x442   :  { %v528_v22 = vadd.f32 %v527_v20, %v520_v21 }
 0x444   :  { %529 = vst [vmem:[%s881_s4] sm:$0xff] %v528_v22 }
 0x445   :  { %534 = vsyncpa [#allocation3], 1 }

</bundles_post_ra>
